<compile_context>
chip_gen: v5e
topology: v5e:2x2
jax: 0.10.0
libtpu: 0.0.40
codegen_flags: <defaults>
</compile_context>

<pallas_src>
import math
import functools

import jax
import jax.numpy as jnp
from jax import lax
from jax.experimental import pallas as pl
from jax.experimental.pallas import tpu as pltpu

LN_EPS = 1e-5  # torch.nn.LayerNorm default eps

_ACTIVATIONS = {
    # torch nn.GELU() default is the exact erf-based gelu
    "gelu": lambda v: jax.nn.gelu(v, approximate=False),
    "relu": lambda v: jnp.maximum(v, 0.0),
    "leakyrelu": lambda v: jnp.where(v >= 0.0, v, 0.01 * v),  # torch default slope 0.01
}


def _lru_layer_kernel(x_ref, ln_w_ref, ln_b_ref, lam_re_ref, lam_im_ref,
                      wb_ref, wc_ref,
                      y_ref,
                      u_re_ref, u_im_ref, h_re_ref, h_im_ref,
                      carry_re_ref, carry_im_ref,
                      *, seq_block, batch_block, activation, mxu_dtype):
    Tc, Bb = seq_block, batch_block
    D = x_ref.shape[-1]

    # A new group of sequences starts at time-chunk 0: reset the recurrent state.
    @pl.when(pl.program_id(1) == 0)
    def _():
        carry_re_ref[...] = jnp.zeros_like(carry_re_ref)
        carry_im_ref[...] = jnp.zeros_like(carry_im_ref)

    x = x_ref[...]                                   # (Tc*Bb, D); rows ordered (t major, b minor)

    # ---- LayerNorm over the feature dim (residual kept in `x`) ----
    mean = jnp.mean(x, axis=-1, keepdims=True)
    cen = x - mean
    var = jnp.mean(cen * cen, axis=-1, keepdims=True)
    xn = cen * lax.rsqrt(var + LN_EPS) * ln_w_ref[...] + ln_b_ref[...]

    # ---- fused input projection: [u_re | u_im] = xn @ [B_re^T | B_im^T]  (one MXU matmul) ----
    u = jnp.dot(xn.astype(mxu_dtype), wb_ref[...].astype(mxu_dtype),
                preferred_element_type=jnp.float32)          # (Tc*Bb, 2D)
    u_re_ref[...] = u[:, :D]
    u_im_ref[...] = u[:, D:]

    # ---- diagonal complex recurrence h_t = lambda * h_{t-1} + u_t, vectorized over Bb seqs ----
    lam_re = jnp.broadcast_to(lam_re_ref[...], (Bb, D))      # hoisted out of the loop
    lam_im = jnp.broadcast_to(lam_im_ref[...], (Bb, D))

    def step(t, carry):
        h_re, h_im = carry                                   # (Bb, D), carried in vregs
        r = pl.multiple_of(t * Bb, Bb)                       # sublane-aligned slab offset
        u_re = u_re_ref[pl.ds(r, Bb), :]
        u_im = u_im_ref[pl.ds(r, Bb), :]
        n_re = lam_re * h_re - lam_im * h_im + u_re
        n_im = lam_im * h_re + lam_re * h_im + u_im
        h_re_ref[pl.ds(r, Bb), :] = n_re
        h_im_ref[pl.ds(r, Bb), :] = n_im
        return (n_re, n_im)

    last_re, last_im = lax.fori_loop(
        0, Tc, step, (carry_re_ref[...], carry_im_ref[...]), unroll=8)
    carry_re_ref[...] = last_re                              # state carried to next time chunk
    carry_im_ref[...] = last_im

    # ---- fused output projection: Re(h @ C^T) = [h_re | h_im] @ [[C_re^T], [-C_im^T]] ----
    h_cat = jnp.concatenate([h_re_ref[...], h_im_ref[...]], axis=-1)   # (Tc*Bb, 2D)
    y_lru = jnp.dot(h_cat.astype(mxu_dtype), wc_ref[...].astype(mxu_dtype),
                    preferred_element_type=jnp.float32)

    # activation, dropout (inference / p=0 -> identity), residual add
    y_ref[...] = (_ACTIVATIONS[activation](y_lru) + x).astype(y_ref.dtype)


def _choose_tiles(B, T, D):
    Bb = 8                                           # one f32 sublane tile of sequences per step
    # time chunk: ~1 MiB of f32 x-block per pipeline buffer, >= 8 steps, <= T
    Tc = max(8, (1 << 20) // (Bb * D * 4))
    Tc = min(Tc, T)
    return Bb, Tc


def lru_layer_forward(x, params, activation="relu", mxu_dtype=jnp.float32):
    """x: (batch, seq, state_dim) float32 -> (batch, seq, state_dim) float32.

    mxu_dtype: dtype of the MXU matmul operands (accumulation is always f32). jnp.bfloat16
    roughly doubles MXU throughput on v6e/v7x; default f32 keeps exact parity with torch f32.
    """
    B, T, D = x.shape
    Bb, Tc = _choose_tiles(B, T, D)
    nb = (B + Bb - 1) // Bb
    nt = (T + Tc - 1) // Tc
    Bpad, Tpad = nb * Bb, nt * Tc

    # -- wrapper-side layout plumbing: zero-pad, go time-major per batch block, flatten to 2-D --
    xp = jnp.pad(x, ((0, Bpad - B), (0, Tpad - T), (0, 0)))
    x2d = (xp.reshape(nb, Bb, Tpad, D)
             .transpose(0, 2, 1, 3)                   # (nb, Tpad, Bb, D)
             .reshape(nb * Tpad * Bb, D))

    ln_w = params["ln_w"].reshape(1, D)
    ln_b = params["ln_b"].reshape(1, D)
    lam_re = params["lam_re"].reshape(1, D)
    lam_im = params["lam_im"].reshape(1, D)
    # fused, pre-transposed projection weights (glue, no hot compute)
    wb = jnp.concatenate([params["Bn_re"].T, params["Bn_im"].T], axis=1)   # (D, 2D)
    wc = jnp.concatenate([params["C_re"].T, -params["C_im"].T], axis=0)    # (2D, D)

    kernel = functools.partial(_lru_layer_kernel, seq_block=Tc, batch_block=Bb,
                               activation=activation, mxu_dtype=mxu_dtype)

    blk = (Tc * Bb, D)
    xy_spec = pl.BlockSpec(blk, lambda b, t: (b * nt + t, 0))
    vec_spec = pl.BlockSpec((1, D), lambda b, t: (0, 0))

    # explicit VMEM budget: double-buffered x/y blocks + (double-buffered) invariant weights
    # + u/h scratch + carries; clamp into [32 MiB, 128 MiB].  (_choose_tiles keeps the per-chunk
    # footprint small enough for v7x's 64 MiB at realistic D.)
    blk_bytes = Tc * Bb * D * 4
    w_bytes = (4 * D * D + 4 * D) * 4
    need = 4 * blk_bytes + 2 * w_bytes + 4 * blk_bytes + 2 * Bb * D * 4
    vmem_limit = int(min(max(2 * need, 32 << 20), 128 << 20))

    m_total = nb * Tpad * Bb
    cost = pl.CostEstimate(
        flops=8 * m_total * D * D + 14 * m_total * D,
        transcendentals=m_total,
        bytes_accessed=(2 * m_total * D + 4 * D * D + 4 * D) * 4,
    )

    y2d = pl.pallas_call(
        kernel,
        out_shape=jax.ShapeDtypeStruct((nb * Tpad * Bb, D), jnp.float32),
        grid_spec=pltpu.PrefetchScalarGridSpec(
            num_scalar_prefetch=0,
            grid=(nb, nt),
            in_specs=[
                xy_spec,                                        # x (time-major per batch block)
                vec_spec, vec_spec,                             # layernorm weight / bias
                vec_spec, vec_spec,                             # lambda re / im
                pl.BlockSpec((D, 2 * D), lambda b, t: (0, 0)),  # [B_re^T | B_im^T]
                pl.BlockSpec((2 * D, D), lambda b, t: (0, 0)),  # [C_re^T ; -C_im^T]
            ],
            out_specs=xy_spec,
            scratch_shapes=[
                pltpu.VMEM((Tc * Bb, D), jnp.float32),   # u_re
                pltpu.VMEM((Tc * Bb, D), jnp.float32),   # u_im
                pltpu.VMEM((Tc * Bb, D), jnp.float32),   # h_re
                pltpu.VMEM((Tc * Bb, D), jnp.float32),   # h_im
                pltpu.VMEM((Bb, D), jnp.float32),        # carry_re (state across time chunks)
                pltpu.VMEM((Bb, D), jnp.float32),        # carry_im
            ],
        ),
        compiler_params=pltpu.CompilerParams(
            dimension_semantics=("parallel", "arbitrary"),
            vmem_limit_bytes=vmem_limit,
        ),
        cost_estimate=cost,
    )(x2d, ln_w, ln_b, lam_re, lam_im, wb, wc)

    # undo the layout plumbing and strip the padding
    y = (y2d.reshape(nb, Tpad, Bb, D)
            .transpose(0, 2, 1, 3)
            .reshape(Bpad, Tpad, D)[:B, :T])
    return y


def init_params(state_dim, key, r_min=0.4, r_max=0.9, phase_max=2.0 * math.pi):
    """Deterministic synthetic init mirroring LRU.__init__ / LayerNorm defaults."""
    k1, k2, k3, k4, k5, k6 = jax.random.split(key, 6)
    u1 = jax.random.uniform(k1, (state_dim,), jnp.float32)
    nu_log = jnp.log(-0.5 * jnp.log(u1 * (r_max + r_min) * (r_max - r_min) + r_min ** 2))
    u2 = jax.random.uniform(k2, (state_dim,), jnp.float32)
    theta_log = jnp.log(phase_max * u2)
    L_mod = jnp.exp(-jnp.exp(nu_log))
    gamma_log = jnp.log(jnp.sqrt(1.0 - jnp.square(L_mod)))

    B_re = jax.random.normal(k3, (state_dim, state_dim), jnp.float32) / math.sqrt(2 * state_dim)
    B_im = jax.random.normal(k4, (state_dim, state_dim), jnp.float32) / math.sqrt(2 * state_dim)
    C_re = jax.random.normal(k5, (state_dim, state_dim), jnp.float32) / math.sqrt(state_dim)
    C_im = jax.random.normal(k6, (state_dim, state_dim), jnp.float32) / math.sqrt(state_dim)

    lam_re = L_mod * jnp.cos(jnp.exp(theta_log))
    lam_im = L_mod * jnp.sin(jnp.exp(theta_log))
    G = jnp.exp(gamma_log)[:, None]
    return dict(
        ln_w=jnp.ones((state_dim,), jnp.float32),
        ln_b=jnp.zeros((state_dim,), jnp.float32),
        lam_re=lam_re, lam_im=lam_im,
        Bn_re=B_re * G, Bn_im=B_im * G,
        C_re=C_re, C_im=C_im,
    )


def reference_forward(x, params, activation="relu"):
    """Pure-JAX reference of LRULayer.forward (eval-mode dropout)."""
    mean = jnp.mean(x, -1, keepdims=True)
    var = jnp.mean((x - mean) ** 2, -1, keepdims=True)
    xn = (x - mean) / jnp.sqrt(var + LN_EPS) * params["ln_w"] + params["ln_b"]

    B_norm = params["Bn_re"] + 1j * params["Bn_im"]
    C = params["C_re"] + 1j * params["C_im"]
    lam = params["lam_re"] + 1j * params["lam_im"]

    u = xn.astype(B_norm.dtype) @ B_norm.T          # (B, T, D) complex

    def step(h, u_t):
        h = lam * h + u_t
        return h, h

    def scan_batch(u_b):
        _, hs = lax.scan(step, jnp.zeros_like(lam), u_b)
        return hs

    hs = jax.vmap(scan_batch)(u)
    y = (hs @ C.T).real
    y = _ACTIVATIONS[activation](y)
    return y + x


if __name__ == "__main__":
    key = jax.random.PRNGKey(0)
    kp, kx = jax.random.split(key)

    batch, seq, state_dim = 2, 8, 32
    activation = "relu"   # from _activations; dropout p=0.0 (inference) -> identity

    params = init_params(state_dim, kp)
    x = jax.random.normal(kx, (batch, seq, state_dim), jnp.float32)

    y = lru_layer_forward(x, params, activation=activation)
    y = jax.block_until_ready(y)

    y_ref = reference_forward(x, params, activation=activation)
    max_err = float(jnp.max(jnp.abs(y - y_ref)))
    assert jnp.allclose(y, y_ref, atol=1e-2, rtol=1e-2), f"max abs err {max_err}"

    print("KERNEL_OK")
</pallas_src>

<mosaic_0001>
module attributes {stable_mosaic.version = 11 : i64} {
  func.func @_lru_layer_kernel(%arg0: i32, %arg1: i32, %arg2: memref<64x32xf32, #tpu.memory_space<vmem>>, %arg3: memref<1x32xf32, #tpu.memory_space<vmem>>, %arg4: memref<1x32xf32, #tpu.memory_space<vmem>>, %arg5: memref<1x32xf32, #tpu.memory_space<vmem>>, %arg6: memref<1x32xf32, #tpu.memory_space<vmem>>, %arg7: memref<32x64xf32, #tpu.memory_space<vmem>>, %arg8: memref<64x32xf32, #tpu.memory_space<vmem>>, %arg9: memref<64x32xf32, #tpu.memory_space<vmem>>, %arg10: memref<64x32xf32, #tpu.memory_space<vmem>>, %arg11: memref<64x32xf32, #tpu.memory_space<vmem>>, %arg12: memref<64x32xf32, #tpu.memory_space<vmem>>, %arg13: memref<64x32xf32, #tpu.memory_space<vmem>>, %arg14: memref<8x32xf32, #tpu.memory_space<vmem>>, %arg15: memref<8x32xf32, #tpu.memory_space<vmem>>) attributes {dimension_semantics = [#tpu.dimension_semantics<parallel>, #tpu.dimension_semantics<arbitrary>], iteration_bounds = array<i64: 1, 1>, scalar_prefetch = 0 : i64, scratch_operands = 6 : i64, tpu.core_type = #tpu.core_type<tc>, window_params = [{transform_indices = @transform_0, window_bounds = array<i64: 64, 32>}, {pipeline_mode = #tpu.pipeline_mode<synchronous>, transform_indices = @transform_1, window_bounds = array<i64: 1, 32>}, {pipeline_mode = #tpu.pipeline_mode<synchronous>, transform_indices = @transform_2, window_bounds = array<i64: 1, 32>}, {pipeline_mode = #tpu.pipeline_mode<synchronous>, transform_indices = @transform_3, window_bounds = array<i64: 1, 32>}, {pipeline_mode = #tpu.pipeline_mode<synchronous>, transform_indices = @transform_4, window_bounds = array<i64: 1, 32>}, {pipeline_mode = #tpu.pipeline_mode<synchronous>, transform_indices = @transform_5, window_bounds = array<i64: 32, 64>}, {pipeline_mode = #tpu.pipeline_mode<synchronous>, transform_indices = @transform_6, window_bounds = array<i64: 64, 32>}, {transform_indices = @transform_7, window_bounds = array<i64: 64, 32>}]} {
    %c0_i32 = arith.constant 0 : i32
    %0 = arith.cmpi eq, %arg1, %c0_i32 : i32
    %1 = arith.extui %0 : i1 to i32
    %c0_i32_0 = arith.constant 0 : i32
    %2 = arith.cmpi ne, %1, %c0_i32_0 : i32
    scf.if %2 {
      %cst_80 = arith.constant 0.000000e+00 : f32
      %195 = vector.broadcast %cst_80 : f32 to vector<8x32xf32>
      %c0_81 = arith.constant 0 : index
      %c0_82 = arith.constant 0 : index
      %196 = vector.load %arg14[%c0_81, %c0_82] : memref<8x32xf32, #tpu.memory_space<vmem>>, vector<8x32xf32>
      tpu.vector_store %arg14[%c0_81, %c0_82], %195 {strides = array<i32>} : memref<8x32xf32, #tpu.memory_space<vmem>>, vector<8x32xf32>,
      %cst_83 = arith.constant 0.000000e+00 : f32
      %197 = vector.broadcast %cst_83 : f32 to vector<8x32xf32>
      %c0_84 = arith.constant 0 : index
      %c0_85 = arith.constant 0 : index
      %198 = vector.load %arg15[%c0_84, %c0_85] : memref<8x32xf32, #tpu.memory_space<vmem>>, vector<8x32xf32>
      tpu.vector_store %arg15[%c0_84, %c0_85], %197 {strides = array<i32>} : memref<8x32xf32, #tpu.memory_space<vmem>>, vector<8x32xf32>,
    } else {
    }
    %c0 = arith.constant 0 : index
    %c0_1 = arith.constant 0 : index
    %3 = vector.load %arg2[%c0, %c0_1] : memref<64x32xf32, #tpu.memory_space<vmem>>, vector<64x32xf32>
    %cst = arith.constant dense<0.000000e+00> : vector<64xf32>
    %4 = vector.multi_reduction <add>, %3, %cst [1] : vector<64x32xf32> to vector<64xf32>
    %5 = vector.shape_cast %4 : vector<64xf32> to vector<64x1xf32>
    %cst_2 = arith.constant 3.200000e+01 : f32
    %6 = vector.broadcast %cst_2 : f32 to vector<64x1xf32>
    %7 = arith.divf %5, %6 : vector<64x1xf32>
    %8 = vector.broadcast %7 : vector<64x1xf32> to vector<64x32xf32>
    %9 = arith.subf %3, %8 : vector<64x32xf32>
    %10 = arith.mulf %9, %9 : vector<64x32xf32>
    %cst_3 = arith.constant dense<0.000000e+00> : vector<64xf32>
    %11 = vector.multi_reduction <add>, %10, %cst_3 [1] : vector<64x32xf32> to vector<64xf32>
    %12 = vector.shape_cast %11 : vector<64xf32> to vector<64x1xf32>
    %cst_4 = arith.constant 3.200000e+01 : f32
    %13 = vector.broadcast %cst_4 : f32 to vector<64x1xf32>
    %14 = arith.divf %12, %13 : vector<64x1xf32>
    %cst_5 = arith.constant 9.99999974E-6 : f32
    %15 = vector.broadcast %cst_5 : f32 to vector<64x1xf32>
    %16 = arith.addf %14, %15 : vector<64x1xf32>
    %17 = math.rsqrt %16 : vector<64x1xf32>
    %18 = vector.broadcast %17 : vector<64x1xf32> to vector<64x32xf32>
    %19 = arith.mulf %9, %18 : vector<64x32xf32>
    %c0_6 = arith.constant 0 : index
    %c0_7 = arith.constant 0 : index
    %20 = vector.load %arg3[%c0_6, %c0_7] : memref<1x32xf32, #tpu.memory_space<vmem>>, vector<1x32xf32>
    %21 = vector.broadcast %20 : vector<1x32xf32> to vector<64x32xf32>
    %22 = arith.mulf %19, %21 : vector<64x32xf32>
    %c0_8 = arith.constant 0 : index
    %c0_9 = arith.constant 0 : index
    %23 = vector.load %arg4[%c0_8, %c0_9] : memref<1x32xf32, #tpu.memory_space<vmem>>, vector<1x32xf32>
    %24 = vector.broadcast %23 : vector<1x32xf32> to vector<64x32xf32>
    %25 = arith.addf %22, %24 : vector<64x32xf32>
    %c0_10 = arith.constant 0 : index
    %c0_11 = arith.constant 0 : index
    %26 = vector.load %arg7[%c0_10, %c0_11] : memref<32x64xf32, #tpu.memory_space<vmem>>, vector<32x64xf32>
    %cst_12 = arith.constant dense<0.000000e+00> : vector<64x64xf32>
    %27 = tpu.matmul %25, %26, %cst_12 {dimension_numbers = #tpu.dot_dimension_numbers<[1], [0], [0], [1], [0, 0, 1, 1], [], []>} : vector<64x32xf32>, vector<32x64xf32>, vector<64x64xf32> -> vector<64x64xf32>
    %28 = vector.extract_strided_slice %27 {offsets = [0, 0], sizes = [64, 32], strides = [1, 1]} : vector<64x64xf32> to vector<64x32xf32>
    %c0_13 = arith.constant 0 : index
    %c0_14 = arith.constant 0 : index
    %29 = vector.load %arg10[%c0_13, %c0_14] : memref<64x32xf32, #tpu.memory_space<vmem>>, vector<64x32xf32>
    tpu.vector_store %arg10[%c0_13, %c0_14], %28 {strides = array<i32>} : memref<64x32xf32, #tpu.memory_space<vmem>>, vector<64x32xf32>,
    %30 = vector.extract_strided_slice %27 {offsets = [0, 32], sizes = [64, 32], strides = [1, 1]} : vector<64x64xf32> to vector<64x32xf32>
    %c0_15 = arith.constant 0 : index
    %c0_16 = arith.constant 0 : index
    %31 = vector.load %arg11[%c0_15, %c0_16] : memref<64x32xf32, #tpu.memory_space<vmem>>, vector<64x32xf32>
    tpu.vector_store %arg11[%c0_15, %c0_16], %30 {strides = array<i32>} : memref<64x32xf32, #tpu.memory_space<vmem>>, vector<64x32xf32>,
    %c0_17 = arith.constant 0 : index
    %c0_18 = arith.constant 0 : index
    %32 = vector.load %arg5[%c0_17, %c0_18] : memref<1x32xf32, #tpu.memory_space<vmem>>, vector<1x32xf32>
    %33 = vector.shape_cast %32 : vector<1x32xf32> to vector<1x32xf32>
    %34 = vector.broadcast %33 : vector<1x32xf32> to vector<8x32xf32>
    %c0_19 = arith.constant 0 : index
    %c0_20 = arith.constant 0 : index
    %35 = vector.load %arg6[%c0_19, %c0_20] : memref<1x32xf32, #tpu.memory_space<vmem>>, vector<1x32xf32>
    %36 = vector.shape_cast %35 : vector<1x32xf32> to vector<1x32xf32>
    %37 = vector.broadcast %36 : vector<1x32xf32> to vector<8x32xf32>
    %c0_21 = arith.constant 0 : index
    %c0_22 = arith.constant 0 : index
    %38 = vector.load %arg14[%c0_21, %c0_22] : memref<8x32xf32, #tpu.memory_space<vmem>>, vector<8x32xf32>
    %c0_23 = arith.constant 0 : index
    %c0_24 = arith.constant 0 : index
    %39 = vector.load %arg15[%c0_23, %c0_24] : memref<8x32xf32, #tpu.memory_space<vmem>>, vector<8x32xf32>
    %c0_i32_25 = arith.constant 0 : i32
    %c8_i32 = arith.constant 8 : i32
    %40 = arith.muli %c0_i32_25, %c8_i32 : i32
    %41 = tpu.assume_multiple %40, 8 : i32
    %42 = arith.index_cast %41 : i32 to index
    %c0_26 = arith.constant 0 : index
    %43 = vector.load %arg10[%42, %c0_26] : memref<64x32xf32, #tpu.memory_space<vmem>>, vector<8x32xf32>
    %44 = arith.index_cast %41 : i32 to index
    %c0_27 = arith.constant 0 : index
    %45 = vector.load %arg11[%44, %c0_27] : memref<64x32xf32, #tpu.memory_space<vmem>>, vector<8x32xf32>
    %46 = arith.mulf %34, %38 : vector<8x32xf32>
    %47 = arith.mulf %37, %39 : vector<8x32xf32>
    %48 = arith.subf %46, %47 : vector<8x32xf32>
    %49 = arith.addf %48, %43 : vector<8x32xf32>
    %50 = arith.mulf %37, %38 : vector<8x32xf32>
    %51 = arith.mulf %34, %39 : vector<8x32xf32>
    %52 = arith.addf %50, %51 : vector<8x32xf32>
    %53 = arith.addf %52, %45 : vector<8x32xf32>
    %54 = arith.index_cast %41 : i32 to index
    %c0_28 = arith.constant 0 : index
    %55 = vector.load %arg12[%54, %c0_28] : memref<64x32xf32, #tpu.memory_space<vmem>>, vector<8x32xf32>
    tpu.vector_store %arg12[%54, %c0_28], %49 {strides = array<i32>} : memref<64x32xf32, #tpu.memory_space<vmem>>, vector<8x32xf32>,
    %56 = arith.index_cast %41 : i32 to index
    %c0_29 = arith.constant 0 : index
    %57 = vector.load %arg13[%56, %c0_29] : memref<64x32xf32, #tpu.memory_space<vmem>>, vector<8x32xf32>
    tpu.vector_store %arg13[%56, %c0_29], %53 {strides = array<i32>} : memref<64x32xf32, #tpu.memory_space<vmem>>, vector<8x32xf32>,
    %c1_i32 = arith.constant 1 : i32
    %c8_i32_30 = arith.constant 8 : i32
    %58 = arith.muli %c1_i32, %c8_i32_30 : i32
    %59 = tpu.assume_multiple %58, 8 : i32
    %60 = arith.index_cast %59 : i32 to index
    %c0_31 = arith.constant 0 : index
    %61 = vector.load %arg10[%60, %c0_31] : memref<64x32xf32, #tpu.memory_space<vmem>>, vector<8x32xf32>
    %62 = arith.index_cast %59 : i32 to index
    %c0_32 = arith.constant 0 : index
    %63 = vector.load %arg11[%62, %c0_32] : memref<64x32xf32, #tpu.memory_space<vmem>>, vector<8x32xf32>
    %64 = arith.mulf %34, %49 : vector<8x32xf32>
    %65 = arith.mulf %37, %53 : vector<8x32xf32>
    %66 = arith.subf %64, %65 : vector<8x32xf32>
    %67 = arith.addf %66, %61 : vector<8x32xf32>
    %68 = arith.mulf %37, %49 : vector<8x32xf32>
    %69 = arith.mulf %34, %53 : vector<8x32xf32>
    %70 = arith.addf %68, %69 : vector<8x32xf32>
    %71 = arith.addf %70, %63 : vector<8x32xf32>
    %72 = arith.index_cast %59 : i32 to index
    %c0_33 = arith.constant 0 : index
    %73 = vector.load %arg12[%72, %c0_33] : memref<64x32xf32, #tpu.memory_space<vmem>>, vector<8x32xf32>
    tpu.vector_store %arg12[%72, %c0_33], %67 {strides = array<i32>} : memref<64x32xf32, #tpu.memory_space<vmem>>, vector<8x32xf32>,
    %74 = arith.index_cast %59 : i32 to index
    %c0_34 = arith.constant 0 : index
    %75 = vector.load %arg13[%74, %c0_34] : memref<64x32xf32, #tpu.memory_space<vmem>>, vector<8x32xf32>
    tpu.vector_store %arg13[%74, %c0_34], %71 {strides = array<i32>} : memref<64x32xf32, #tpu.memory_space<vmem>>, vector<8x32xf32>,
    %c2_i32 = arith.constant 2 : i32
    %c8_i32_35 = arith.constant 8 : i32
    %76 = arith.muli %c2_i32, %c8_i32_35 : i32
    %77 = tpu.assume_multiple %76, 8 : i32
    %78 = arith.index_cast %77 : i32 to index
    %c0_36 = arith.constant 0 : index
    %79 = vector.load %arg10[%78, %c0_36] : memref<64x32xf32, #tpu.memory_space<vmem>>, vector<8x32xf32>
    %80 = arith.index_cast %77 : i32 to index
    %c0_37 = arith.constant 0 : index
    %81 = vector.load %arg11[%80, %c0_37] : memref<64x32xf32, #tpu.memory_space<vmem>>, vector<8x32xf32>
    %82 = arith.mulf %34, %67 : vector<8x32xf32>
    %83 = arith.mulf %37, %71 : vector<8x32xf32>
    %84 = arith.subf %82, %83 : vector<8x32xf32>
    %85 = arith.addf %84, %79 : vector<8x32xf32>
    %86 = arith.mulf %37, %67 : vector<8x32xf32>
    %87 = arith.mulf %34, %71 : vector<8x32xf32>
    %88 = arith.addf %86, %87 : vector<8x32xf32>
    %89 = arith.addf %88, %81 : vector<8x32xf32>
    %90 = arith.index_cast %77 : i32 to index
    %c0_38 = arith.constant 0 : index
    %91 = vector.load %arg12[%90, %c0_38] : memref<64x32xf32, #tpu.memory_space<vmem>>, vector<8x32xf32>
    tpu.vector_store %arg12[%90, %c0_38], %85 {strides = array<i32>} : memref<64x32xf32, #tpu.memory_space<vmem>>, vector<8x32xf32>,
    %92 = arith.index_cast %77 : i32 to index
    %c0_39 = arith.constant 0 : index
    %93 = vector.load %arg13[%92, %c0_39] : memref<64x32xf32, #tpu.memory_space<vmem>>, vector<8x32xf32>
    tpu.vector_store %arg13[%92, %c0_39], %89 {strides = array<i32>} : memref<64x32xf32, #tpu.memory_space<vmem>>, vector<8x32xf32>,
    %c3_i32 = arith.constant 3 : i32
    %c8_i32_40 = arith.constant 8 : i32
    %94 = arith.muli %c3_i32, %c8_i32_40 : i32
    %95 = tpu.assume_multiple %94, 8 : i32
    %96 = arith.index_cast %95 : i32 to index
    %c0_41 = arith.constant 0 : index
    %97 = vector.load %arg10[%96, %c0_41] : memref<64x32xf32, #tpu.memory_space<vmem>>, vector<8x32xf32>
    %98 = arith.index_cast %95 : i32 to index
    %c0_42 = arith.constant 0 : index
    %99 = vector.load %arg11[%98, %c0_42] : memref<64x32xf32, #tpu.memory_space<vmem>>, vector<8x32xf32>
    %100 = arith.mulf %34, %85 : vector<8x32xf32>
    %101 = arith.mulf %37, %89 : vector<8x32xf32>
    %102 = arith.subf %100, %101 : vector<8x32xf32>
    %103 = arith.addf %102, %97 : vector<8x32xf32>
    %104 = arith.mulf %37, %85 : vector<8x32xf32>
    %105 = arith.mulf %34, %89 : vector<8x32xf32>
    %106 = arith.addf %104, %105 : vector<8x32xf32>
    %107 = arith.addf %106, %99 : vector<8x32xf32>
    %108 = arith.index_cast %95 : i32 to index
    %c0_43 = arith.constant 0 : index
    %109 = vector.load %arg12[%108, %c0_43] : memref<64x32xf32, #tpu.memory_space<vmem>>, vector<8x32xf32>
    tpu.vector_store %arg12[%108, %c0_43], %103 {strides = array<i32>} : memref<64x32xf32, #tpu.memory_space<vmem>>, vector<8x32xf32>,
    %110 = arith.index_cast %95 : i32 to index
    %c0_44 = arith.constant 0 : index
    %111 = vector.load %arg13[%110, %c0_44] : memref<64x32xf32, #tpu.memory_space<vmem>>, vector<8x32xf32>
    tpu.vector_store %arg13[%110, %c0_44], %107 {strides = array<i32>} : memref<64x32xf32, #tpu.memory_space<vmem>>, vector<8x32xf32>,
    %c4_i32 = arith.constant 4 : i32
    %c8_i32_45 = arith.constant 8 : i32
    %112 = arith.muli %c4_i32, %c8_i32_45 : i32
    %113 = tpu.assume_multiple %112, 8 : i32
    %114 = arith.index_cast %113 : i32 to index
    %c0_46 = arith.constant 0 : index
    %115 = vector.load %arg10[%114, %c0_46] : memref<64x32xf32, #tpu.memory_space<vmem>>, vector<8x32xf32>
    %116 = arith.index_cast %113 : i32 to index
    %c0_47 = arith.constant 0 : index
    %117 = vector.load %arg11[%116, %c0_47] : memref<64x32xf32, #tpu.memory_space<vmem>>, vector<8x32xf32>
    %118 = arith.mulf %34, %103 : vector<8x32xf32>
    %119 = arith.mulf %37, %107 : vector<8x32xf32>
    %120 = arith.subf %118, %119 : vector<8x32xf32>
    %121 = arith.addf %120, %115 : vector<8x32xf32>
    %122 = arith.mulf %37, %103 : vector<8x32xf32>
    %123 = arith.mulf %34, %107 : vector<8x32xf32>
    %124 = arith.addf %122, %123 : vector<8x32xf32>
    %125 = arith.addf %124, %117 : vector<8x32xf32>
    %126 = arith.index_cast %113 : i32 to index
    %c0_48 = arith.constant 0 : index
    %127 = vector.load %arg12[%126, %c0_48] : memref<64x32xf32, #tpu.memory_space<vmem>>, vector<8x32xf32>
    tpu.vector_store %arg12[%126, %c0_48], %121 {strides = array<i32>} : memref<64x32xf32, #tpu.memory_space<vmem>>, vector<8x32xf32>,
    %128 = arith.index_cast %113 : i32 to index
    %c0_49 = arith.constant 0 : index
    %129 = vector.load %arg13[%128, %c0_49] : memref<64x32xf32, #tpu.memory_space<vmem>>, vector<8x32xf32>
    tpu.vector_store %arg13[%128, %c0_49], %125 {strides = array<i32>} : memref<64x32xf32, #tpu.memory_space<vmem>>, vector<8x32xf32>,
    %c5_i32 = arith.constant 5 : i32
    %c8_i32_50 = arith.constant 8 : i32
    %130 = arith.muli %c5_i32, %c8_i32_50 : i32
    %131 = tpu.assume_multiple %130, 8 : i32
    %132 = arith.index_cast %131 : i32 to index
    %c0_51 = arith.constant 0 : index
    %133 = vector.load %arg10[%132, %c0_51] : memref<64x32xf32, #tpu.memory_space<vmem>>, vector<8x32xf32>
    %134 = arith.index_cast %131 : i32 to index
    %c0_52 = arith.constant 0 : index
    %135 = vector.load %arg11[%134, %c0_52] : memref<64x32xf32, #tpu.memory_space<vmem>>, vector<8x32xf32>
    %136 = arith.mulf %34, %121 : vector<8x32xf32>
    %137 = arith.mulf %37, %125 : vector<8x32xf32>
    %138 = arith.subf %136, %137 : vector<8x32xf32>
    %139 = arith.addf %138, %133 : vector<8x32xf32>
    %140 = arith.mulf %37, %121 : vector<8x32xf32>
    %141 = arith.mulf %34, %125 : vector<8x32xf32>
    %142 = arith.addf %140, %141 : vector<8x32xf32>
    %143 = arith.addf %142, %135 : vector<8x32xf32>
    %144 = arith.index_cast %131 : i32 to index
    %c0_53 = arith.constant 0 : index
    %145 = vector.load %arg12[%144, %c0_53] : memref<64x32xf32, #tpu.memory_space<vmem>>, vector<8x32xf32>
    tpu.vector_store %arg12[%144, %c0_53], %139 {strides = array<i32>} : memref<64x32xf32, #tpu.memory_space<vmem>>, vector<8x32xf32>,
    %146 = arith.index_cast %131 : i32 to index
    %c0_54 = arith.constant 0 : index
    %147 = vector.load %arg13[%146, %c0_54] : memref<64x32xf32, #tpu.memory_space<vmem>>, vector<8x32xf32>
    tpu.vector_store %arg13[%146, %c0_54], %143 {strides = array<i32>} : memref<64x32xf32, #tpu.memory_space<vmem>>, vector<8x32xf32>,
    %c6_i32 = arith.constant 6 : i32
    %c8_i32_55 = arith.constant 8 : i32
    %148 = arith.muli %c6_i32, %c8_i32_55 : i32
    %149 = tpu.assume_multiple %148, 8 : i32
    %150 = arith.index_cast %149 : i32 to index
    %c0_56 = arith.constant 0 : index
    %151 = vector.load %arg10[%150, %c0_56] : memref<64x32xf32, #tpu.memory_space<vmem>>, vector<8x32xf32>
    %152 = arith.index_cast %149 : i32 to index
    %c0_57 = arith.constant 0 : index
    %153 = vector.load %arg11[%152, %c0_57] : memref<64x32xf32, #tpu.memory_space<vmem>>, vector<8x32xf32>
    %154 = arith.mulf %34, %139 : vector<8x32xf32>
    %155 = arith.mulf %37, %143 : vector<8x32xf32>
    %156 = arith.subf %154, %155 : vector<8x32xf32>
    %157 = arith.addf %156, %151 : vector<8x32xf32>
    %158 = arith.mulf %37, %139 : vector<8x32xf32>
    %159 = arith.mulf %34, %143 : vector<8x32xf32>
    %160 = arith.addf %158, %159 : vector<8x32xf32>
    %161 = arith.addf %160, %153 : vector<8x32xf32>
    %162 = arith.index_cast %149 : i32 to index
    %c0_58 = arith.constant 0 : index
    %163 = vector.load %arg12[%162, %c0_58] : memref<64x32xf32, #tpu.memory_space<vmem>>, vector<8x32xf32>
    tpu.vector_store %arg12[%162, %c0_58], %157 {strides = array<i32>} : memref<64x32xf32, #tpu.memory_space<vmem>>, vector<8x32xf32>,
    %164 = arith.index_cast %149 : i32 to index
    %c0_59 = arith.constant 0 : index
    %165 = vector.load %arg13[%164, %c0_59] : memref<64x32xf32, #tpu.memory_space<vmem>>, vector<8x32xf32>
    tpu.vector_store %arg13[%164, %c0_59], %161 {strides = array<i32>} : memref<64x32xf32, #tpu.memory_space<vmem>>, vector<8x32xf32>,
    %c7_i32 = arith.constant 7 : i32
    %c8_i32_60 = arith.constant 8 : i32
    %166 = arith.muli %c7_i32, %c8_i32_60 : i32
    %167 = tpu.assume_multiple %166, 8 : i32
    %168 = arith.index_cast %167 : i32 to index
    %c0_61 = arith.constant 0 : index
    %169 = vector.load %arg10[%168, %c0_61] : memref<64x32xf32, #tpu.memory_space<vmem>>, vector<8x32xf32>
    %170 = arith.index_cast %167 : i32 to index
    %c0_62 = arith.constant 0 : index
    %171 = vector.load %arg11[%170, %c0_62] : memref<64x32xf32, #tpu.memory_space<vmem>>, vector<8x32xf32>
    %172 = arith.mulf %34, %157 : vector<8x32xf32>
    %173 = arith.mulf %37, %161 : vector<8x32xf32>
    %174 = arith.subf %172, %173 : vector<8x32xf32>
    %175 = arith.addf %174, %169 : vector<8x32xf32>
    %176 = arith.mulf %37, %157 : vector<8x32xf32>
    %177 = arith.mulf %34, %161 : vector<8x32xf32>
    %178 = arith.addf %176, %177 : vector<8x32xf32>
    %179 = arith.addf %178, %171 : vector<8x32xf32>
    %180 = arith.index_cast %167 : i32 to index
    %c0_63 = arith.constant 0 : index
    %181 = vector.load %arg12[%180, %c0_63] : memref<64x32xf32, #tpu.memory_space<vmem>>, vector<8x32xf32>
    tpu.vector_store %arg12[%180, %c0_63], %175 {strides = array<i32>} : memref<64x32xf32, #tpu.memory_space<vmem>>, vector<8x32xf32>,
    %182 = arith.index_cast %167 : i32 to index
    %c0_64 = arith.constant 0 : index
    %183 = vector.load %arg13[%182, %c0_64] : memref<64x32xf32, #tpu.memory_space<vmem>>, vector<8x32xf32>
    tpu.vector_store %arg13[%182, %c0_64], %179 {strides = array<i32>} : memref<64x32xf32, #tpu.memory_space<vmem>>, vector<8x32xf32>,
    %c8_i32_65 = arith.constant 8 : i32
    %c0_66 = arith.constant 0 : index
    %c0_67 = arith.constant 0 : index
    %184 = vector.load %arg14[%c0_66, %c0_67] : memref<8x32xf32, #tpu.memory_space<vmem>>, vector<8x32xf32>
    tpu.vector_store %arg14[%c0_66, %c0_67], %175 {strides = array<i32>} : memref<8x32xf32, #tpu.memory_space<vmem>>, vector<8x32xf32>,
    %c0_68 = arith.constant 0 : index
    %c0_69 = arith.constant 0 : index
    %185 = vector.load %arg15[%c0_68, %c0_69] : memref<8x32xf32, #tpu.memory_space<vmem>>, vector<8x32xf32>
    tpu.vector_store %arg15[%c0_68, %c0_69], %179 {strides = array<i32>} : memref<8x32xf32, #tpu.memory_space<vmem>>, vector<8x32xf32>,
    %c0_70 = arith.constant 0 : index
    %c0_71 = arith.constant 0 : index
    %186 = vector.load %arg12[%c0_70, %c0_71] : memref<64x32xf32, #tpu.memory_space<vmem>>, vector<64x32xf32>
    %c0_72 = arith.constant 0 : index
    %c0_73 = arith.constant 0 : index
    %187 = vector.load %arg13[%c0_72, %c0_73] : memref<64x32xf32, #tpu.memory_space<vmem>>, vector<64x32xf32>
    %188 = tpu.concatenate %186, %187 in 1 : vector<64x32xf32>, vector<64x32xf32> -> vector<64x64xf32>
    %c0_74 = arith.constant 0 : index
    %c0_75 = arith.constant 0 : index
    %189 = vector.load %arg8[%c0_74, %c0_75] : memref<64x32xf32, #tpu.memory_space<vmem>>, vector<64x32xf32>
    %cst_76 = arith.constant dense<0.000000e+00> : vector<64x32xf32>
    %190 = tpu.matmul %188, %189, %cst_76 {dimension_numbers = #tpu.dot_dimension_numbers<[1], [0], [0], [1], [0, 0, 1, 1], [], []>} : vector<64x64xf32>, vector<64x32xf32>, vector<64x32xf32> -> vector<64x32xf32>
    %cst_77 = arith.constant 0.000000e+00 : f32
    %191 = vector.broadcast %cst_77 : f32 to vector<64x32xf32>
    %192 = arith.maximumf %190, %191 : vector<64x32xf32>
    %193 = arith.addf %192, %3 : vector<64x32xf32>
    %c0_78 = arith.constant 0 : index
    %c0_79 = arith.constant 0 : index
    %194 = vector.load %arg9[%c0_78, %c0_79] : memref<64x32xf32, #tpu.memory_space<vmem>>, vector<64x32xf32>
    tpu.vector_store %arg9[%c0_78, %c0_79], %193 {strides = array<i32>} : memref<64x32xf32, #tpu.memory_space<vmem>>, vector<64x32xf32>,
    return
  }
  func.func @transform_0(%arg0: i32, %arg1: i32) -> (i32, i32) {
    %c1_i32 = arith.constant 1 : i32
    %0 = arith.muli %arg0, %c1_i32 : i32
    %1 = arith.addi %0, %arg1 : i32
    %c0_i32 = arith.constant 0 : i32
    %c0_i32_0 = arith.constant 0 : i32
    return %1, %c0_i32 : i32, i32
  }
  func.func @transform_1(%arg0: i32, %arg1: i32) -> (i32, i32) {
    %c0_i32 = arith.constant 0 : i32
    %c0_i32_0 = arith.constant 0 : i32
    %c0_i32_1 = arith.constant 0 : i32
    return %c0_i32, %c0_i32_0 : i32, i32
  }
  func.func @transform_2(%arg0: i32, %arg1: i32) -> (i32, i32) {
    %c0_i32 = arith.constant 0 : i32
    %c0_i32_0 = arith.constant 0 : i32
    %c0_i32_1 = arith.constant 0 : i32
    return %c0_i32, %c0_i32_0 : i32, i32
  }
  func.func @transform_3(%arg0: i32, %arg1: i32) -> (i32, i32) {
    %c0_i32 = arith.constant 0 : i32
    %c0_i32_0 = arith.constant 0 : i32
    %c0_i32_1 = arith.constant 0 : i32
    return %c0_i32, %c0_i32_0 : i32, i32
  }
  func.func @transform_4(%arg0: i32, %arg1: i32) -> (i32, i32) {
    %c0_i32 = arith.constant 0 : i32
    %c0_i32_0 = arith.constant 0 : i32
    %c0_i32_1 = arith.constant 0 : i32
    return %c0_i32, %c0_i32_0 : i32, i32
  }
  func.func @transform_5(%arg0: i32, %arg1: i32) -> (i32, i32) {
    %c0_i32 = arith.constant 0 : i32
    %c0_i32_0 = arith.constant 0 : i32
    %c0_i32_1 = arith.constant 0 : i32
    return %c0_i32, %c0_i32_0 : i32, i32
  }
  func.func @transform_6(%arg0: i32, %arg1: i32) -> (i32, i32) {
    %c0_i32 = arith.constant 0 : i32
    %c0_i32_0 = arith.constant 0 : i32
    %c0_i32_1 = arith.constant 0 : i32
    return %c0_i32, %c0_i32_0 : i32, i32
  }
  func.func @transform_7(%arg0: i32, %arg1: i32) -> (i32, i32) {
    %c1_i32 = arith.constant 1 : i32
    %0 = arith.muli %arg0, %c1_i32 : i32
    %1 = arith.addi %0, %arg1 : i32
    %c0_i32 = arith.constant 0 : i32
    %c0_i32_0 = arith.constant 0 : i32
    return %1, %c0_i32 : i32, i32
  }
}

</mosaic_0001>

<bundles_post_ra>
// kernel: tpu_custom_call.1
= control target key start
LH: loop header
LB: loop body
LE: loop exit
PB: predicated region body
PF: predicated region fallthrough
CT: control target
= control target key end

     0   :  { %vm66_vm0 = vcmask 261120   ;;  %v778_v16 = vmov 32.0   ;;  %s780_s29 = smov 96   ;;  %s1242_s0 = inlined_call_operand.vmem [shape: f32[64,32], index: 0, kind: input, shape index: {}]   ;;  %s1243_s1 = inlined_call_operand.vmem [shape: f32[1,32], index: 1, kind: input, shape index: {}]   ;;  %s1244_s2 = inlined_call_operand.vmem [shape: f32[1,32], index: 2, kind: input, shape index: {}]   ;;  %s1245_s3 = inlined_call_operand.vmem [shape: f32[1,32], index: 3, kind: input, shape index: {}]   ;;  %s1246_s4 = inlined_call_operand.vmem [shape: f32[1,32], index: 4, kind: input, shape index: {}]   ;;  %s1247_s5 = inlined_call_operand.vmem [shape: f32[32,64], index: 5, kind: input, shape index: {}]   ;;  %s1248_s6 = inlined_call_operand.vmem [shape: f32[64,32], index: 6, kind: input, shape index: {}]   ;;  %s1249_s7 = inlined_call_operand.vmem [shape: f32[64,32], index: 7, kind: output, shape index: {}]  }
   0x1   :  { %v825_v0 = vld [vmem:[%s1242_s0 + $0x10] sm:$0xff]  ;;  %v830_v1 = vld [vmem:[%s1242_s0] sm:$0xff]  ;;  %v846_v6 = vld [vmem:[%s1242_s0 + $0x18] sm:$0xff]  ;;  %760 = vrcp.f32 %v778_v16 }
   0x2   :  { %v835_v2 = vld [vmem:[%s1242_s0 + $0x20] sm:$0xff]  ;;  %v84_v3 = vsel %vm66_vm0, %v825_v0, 0.0  ;;  %v78_v4 = vsel %vm66_vm0, %v830_v1, 0.0  ;;  %v851_v7 = vld [vmem:[%s1242_s0 + $0x8] sm:$0xff]  ;;  %v87_v9 = vsel %vm66_vm0, %v846_v6, 0.0  ;;  %v867_v12 = vld [vmem:[%s1242_s0 + $0x30] sm:$0xff] }
   0x3   :  { %v90_v5 = vsel %vm66_vm0, %v835_v2, 0.0  ;;  %85 = vadd.xlane.f32.xlu1 %v84_v3  ;;  %79 = vadd.xlane.f32.xlu0 %v78_v4  ;;  %v856_v8 = vld [vmem:[%s1242_s0 + $0x28] sm:$0xff]  ;;  %v81_v10 = vsel %vm66_vm0, %v851_v7, 0.0  ;;  %v872_v13 = vld [vmem:[%s1242_s0 + $0x38] sm:$0xff]  ;;  %v96_v14 = vsel %vm66_vm0, %v867_v12, 0.0  ;;  %v287_v3 = vld [vmem:[%s1247_s5 + $0x10] sm:$0xff] }
   0x4   :  { %91 = vadd.xlane.f32.xlu2 %v90_v5  ;;  %v93_v11 = vsel %vm66_vm0, %v856_v8, 0.0  ;;  %v99_v15 = vsel %vm66_vm0, %v872_v13, 0.0  ;;  %v288_v63 = vld [vmem:[%s1247_s5 + $0x18] sm:$0xff]  ;;  %v286_v4 = vld [vmem:[%s1247_s5 + $0x8] sm:$0xff]  ;;  %v285_v5 = vld [vmem:[%s1247_s5] sm:$0xff] }
   0x5   :  { %325 = vmatpush.msra.mxu0 %v288_v63  ;;  %740 = vmatpush.msra.mxu3 %v288_v63 }
   0x7   :  { %v761_v17 = vpop.eup %760  ;;  %326 = vmatpush.msra.mxu0 %v287_v3  ;;  %741 = vmatpush.msra.mxu3 %v287_v3 }
   0x8   :  { %v103_v18 = vmul.f32 32.0, %v761_v17  ;;  %vm107_vm1 = vweird.f32 %v761_v17 }
   0x9   :  { %327 = vmatpush.msra.mxu0 %v286_v4  ;;  %742 = vmatpush.msra.mxu3 %v286_v4 }
   0xa   :  { %v104_v19 = vsub.f32 1.0, %v103_v18 }
   0xb   :  { %88 = vadd.xlane.f32.xlu1 %v87_v9  ;;  %82 = vadd.xlane.f32.xlu0 %v81_v10 }
   0xc   :  { %94 = vadd.xlane.f32.xlu2 %v93_v11  ;;  %v105_v20 = vmul.f32 %v761_v17, %v104_v19  ;;  %328 = vmatpush.msra.mxu0 %v285_v5 }
   0xd   :  { %743 = vmatpush.msra.mxu3 %v285_v5 }
   0xe   :  { %v106_v21 = vadd.f32 %v761_v17, %v105_v20 }
  0x10   :  { %v878_v22 = vsel %vm107_vm1, %v761_v17, %v106_v21 }
  0x13   :  { %97 = vadd.xlane.f32.xlu0 %v96_v14 }
  0x14   :  { %100 = vadd.xlane.f32.xlu2 %v99_v15 }
  0x76   :  { %v86_v23 = vpop.xlane.xlu1 %85  ;;  %v80_v24 = vpop.xlane.xlu0 %79 }
  0x77   :  { %v111_v25 = vmul.f32 %v878_v22, %v86_v23  ;;  %v109_v26 = vmul.f32 %v878_v22, %v80_v24  ;;  %v92_v27 = vpop.xlane.xlu2 %91 }
  0x78   :  { %v113_v38 = vmul.f32 %v878_v22, %v92_v27 }
  0x79   :  { %v883_v28 = vsub.f32 %v830_v1, %v109_v26  ;;  %v886_v29 = vsub.f32 %v825_v0, %v111_v25 }
  0x7a   :  { %v912_v46 = vsub.f32 %v835_v2, %v113_v38 }
  0x7b   :  { %v125_v30 = vmul.f32 %v883_v28, %v883_v28  ;;  %v127_v37 = vmul.f32 %v886_v29, %v886_v29 }
  0x7c   :  { %v129_v54 = vmul.f32 %v912_v46, %v912_v46 }
  0x7d   :  { %v133_v31 = vsel %vm66_vm0, %v125_v30, 0.0  ;;  %v139_v44 = vsel %vm66_vm0, %v127_v37, 0.0 }
  0x7e   :  { %v89_v32 = vpop.xlane.xlu1 %88  ;;  %134 = vadd.xlane.f32.xlu1 %v133_v31  ;;  %v83_v33 = vpop.xlane.xlu0 %82  ;;  %v145_v59 = vsel %vm66_vm0, %v129_v54, 0.0 }
  0x7f   :  { %v112_v34 = vmul.f32 %v878_v22, %v89_v32  ;;  %v110_v35 = vmul.f32 %v878_v22, %v83_v33  ;;  %v95_v36 = vpop.xlane.xlu2 %94 }
  0x80   :  { %v114_v39 = vmul.f32 %v878_v22, %v95_v36 }
  0x81   :  { %v898_v40 = vsub.f32 %v846_v6, %v112_v34  ;;  %v901_v41 = vsub.f32 %v851_v7, %v110_v35 }
  0x82   :  { %v904_v42 = vsub.f32 %v856_v8, %v114_v39 }
  0x83   :  { %v128_v43 = vmul.f32 %v898_v40, %v898_v40  ;;  %v126_v45 = vmul.f32 %v901_v41, %v901_v41 }
  0x84   :  { %v130_v52 = vmul.f32 %v904_v42, %v904_v42 }
  0x85   :  { %v142_v47 = vsel %vm66_vm0, %v128_v43, 0.0  ;;  %v136_v48 = vsel %vm66_vm0, %v126_v45, 0.0 }
  0x86   :  { %143 = vadd.xlane.f32.xlu2 %v142_v47  ;;  %140 = vadd.xlane.f32.xlu1 %v139_v44  ;;  %v98_v49 = vpop.xlane.xlu0 %97  ;;  %v148_v56 = vsel %vm66_vm0, %v130_v52, 0.0  ;;  %v976_v52 = vld [vmem:[%s1243_s1] ss:$0 sm:$0xff] }
  0x87   :  { %137 = vadd.xlane.f32.xlu0 %v136_v48  ;;  %v115_v50 = vmul.f32 %v878_v22, %v98_v49  ;;  %v101_v51 = vpop.xlane.xlu2 %100 }
  0x88   :  { %v116_v53 = vmul.f32 %v878_v22, %v101_v51 }
  0x89   :  { %v923_v55 = vsub.f32 %v867_v12, %v115_v50 }
  0x8a   :  { %v929_v58 = vsub.f32 %v872_v13, %v116_v53 }
  0x8b   :  { %v131_v57 = vmul.f32 %v923_v55, %v923_v55 }
  0x8c   :  { %v132_v61 = vmul.f32 %v929_v58, %v929_v58 }
  0x8d   :  { %v151_v60 = vsel %vm66_vm0, %v131_v57, 0.0 }
  0x8e   :  { %149 = vadd.xlane.f32.xlu1 %v148_v56  ;;  %152 = vadd.xlane.f32.xlu2 %v151_v60  ;;  %v154_v62 = vsel %vm66_vm0, %v132_v61, 0.0  ;;  %v986_v61 = vld [vmem:[%s1244_s2] ss:$0 sm:$0xff] }
  0x8f   :  { %146 = vadd.xlane.f32.xlu0 %v145_v59 }
  0x97   :  { %155 = vadd.xlane.f32.xlu0 %v154_v62 }
  0xf1   :  { %v135_v9 = vpop.xlane.xlu1 %134 }
  0xf2   :  { %v157_v10 = vmul.f32 %v135_v9, %v878_v22 }
  0xf4   :  { %v165_v11 = vadd.f32 1e-05, %v157_v10 }
  0xf6   :  { %762 = vrsqrt.f32 %v165_v11  ;;  %vm179_vm3 = vweird.f32 %v165_v11 }
  0xf9   :  { %v144_v14 = vpop.xlane.xlu2 %143  ;;  %v141_v15 = vpop.xlane.xlu1 %140 }
  0xfa   :  { %v160_v16 = vmul.f32 %v144_v14, %v878_v22  ;;  %v159_v17 = vmul.f32 %v141_v15, %v878_v22  ;;  %v138_v18 = vpop.xlane.xlu0 %137 }
  0xfb   :  { %v158_v19 = vmul.f32 %v138_v18, %v878_v22 }
  0xfc   :  { %v763_v20 = vpop.eup %762  ;;  %v952_v21 = vadd.f32 1e-05, %v160_v16  ;;  %v954_v23 = vadd.f32 1e-05, %v159_v17 }
  0xfd   :  { %v174_v24 = vmul.f32 %v763_v20, %v165_v11  ;;  %v166_v25 = vadd.f32 1e-05, %v158_v19  ;;  %vm180_vm2 = vweird.f32 %v763_v20 }
  0xfe   :  { %764 = vrsqrt.f32 %v952_v21  ;;  %vm181_vm4 = vmor %vm179_vm3, %vm180_vm2  ;;  %vm199_vm5 = vweird.f32 %v954_v23  ;;  %vm209_vm1 = vweird.f32 %v952_v21 }
  0xff   :  { %v175_v26 = vmul.f32 %v763_v20, %v174_v24  ;;  %766 = vrsqrt.f32 %v954_v23  ;;  %vm189_vm8 = vweird.f32 %v166_v25 }
 0x100   :  { %768 = vrsqrt.f32 %v166_v25 }
 0x101   :  { %v176_v27 = vmul.f32 0.5, %v175_v26  ;;  %v150_v30 = vpop.xlane.xlu1 %149  ;;  %v153_v31 = vpop.xlane.xlu2 %152 }
 0x102   :  { %v162_v32 = vmul.f32 %v150_v30, %v878_v22  ;;  %v163_v33 = vmul.f32 %v153_v31, %v878_v22  ;;  %v147_v34 = vpop.xlane.xlu0 %146 }
 0x103   :  { %v177_v35 = vsub.f32 1.5, %v176_v27  ;;  %v161_v36 = vmul.f32 %v147_v34, %v878_v22 }
 0x104   :  { %v961_v37 = vpop.eup %764  ;;  %v170_v38 = vadd.f32 1e-05, %v162_v32  ;;  %v963_v39 = vadd.f32 1e-05, %v163_v33 }
 0x105   :  { %v965_v43 = vpop.eup %766  ;;  %v178_v44 = vmul.f32 %v763_v20, %v177_v35  ;;  %v967_v45 = vadd.f32 1e-05, %v161_v36  ;;  %v204_v48 = vmul.f32 %v961_v37, %v952_v21  ;;  %vm210_vm2 = vweird.f32 %v961_v37 }
 0x106   :  { %v769_v47 = vpop.eup %768  ;;  %v194_v49 = vmul.f32 %v965_v43, %v954_v23  ;;  %770 = vrsqrt.f32 %v170_v38  ;;  %vm200_vm6 = vweird.f32 %v965_v43  ;;  %vm229_vm10 = vweird.f32 %v170_v38 }
 0x107   :  { %v182_v50 = vsel %vm181_vm4, %v763_v20, %v178_v44  ;;  %v184_v51 = vmul.f32 %v769_v47, %v166_v25  ;;  %772 = vrsqrt.f32 %v963_v39  ;;  %v205_v57 = vmul.f32 %v961_v37, %v204_v48  ;;  %vm1007_vm13 = vmor %vm199_vm5, %vm200_vm6 }
 0x108   :  { %v195_v53 = vmul.f32 %v965_v43, %v194_v49  ;;  %774 = vrsqrt.f32 %v967_v45  ;;  %v253_v56 = vmul.f32 %v182_v50, %v883_v28  ;;  %vm190_vm7 = vweird.f32 %v769_v47  ;;  %vm1039_vm4 = vmor %vm209_vm1, %vm210_vm2 }
 0x109   :  { %v185_v54 = vmul.f32 %v769_v47, %v184_v51  ;;  %v206_v11 = vmul.f32 0.5, %v205_v57  ;;  %vm191_vm9 = vmor %vm189_vm8, %vm190_vm7  ;;  %vm239_vm12 = vweird.f32 %v963_v39  ;;  %v779_v44 = vmov 0.0  }
 0x10a   :  { %v196_v59 = vmul.f32 0.5, %v195_v53  ;;  %v156_v60 = vpop.xlane.xlu0 %155  ;;  %v265_v3 = vmul.f32 %v976_v52, %v253_v56  ;;  %67 = vst.msk [vmem:[#allocation6] sm:$0xff] %vm66_vm0, %v779_v44  ;;  %vm219_vm7 = vweird.f32 %v967_v45 }
 0x10b   :  { %v186_v62 = vmul.f32 0.5, %v185_v54  ;;  %v164_v63 = vmul.f32 %v156_v60, %v878_v22  ;;  %v207_v30 = vsub.f32 1.5, %v206_v11  ;;  %68 = vst.msk [vmem:[#allocation7] sm:$0xff] %vm66_vm0, %v779_v44 }
 0x10c   :  { %v771_v4 = vpop.eup %770  ;;  %v197_v5 = vsub.f32 1.5, %v196_v59  ;;  %v277_v16 = vadd.f32 %v986_v61, %v265_v3 }
 0x10d   :  { %v187_v28 = vsub.f32 1.5, %v186_v62  ;;  %v224_v9 = vmul.f32 %v771_v4, %v170_v38  ;;  %v773_v10 = vpop.eup %772  ;;  %v993_v15 = vadd.f32 1e-05, %v164_v63  ;;  %vm230_vm11 = vweird.f32 %v771_v4 }
 0x10e   :  { %v198_v14 = vmul.f32 %v965_v43, %v197_v5  ;;  %v996_v22 = vpop.eup %774  ;;  %v234_v19 = vmul.f32 %v773_v10, %v963_v39  ;;  %724 = vmatmul.msk.f32.vlgmr.msra.gmra.mxu0 %vm66_vm0, %v277_v16  ;;  %vm240_vm14 = vweird.f32 %v773_v10  ;;  %vm1019_vm15 = vmor %vm229_vm10, %vm230_vm11  ;;  %v208_v50 = vmul.f32 %v961_v37, %v207_v30 }
 0x10f   :  { %v188_v17 = vmul.f32 %v769_v47, %v187_v28  ;;  %v225_v18 = vmul.f32 %v771_v4, %v224_v9  ;;  %v214_v20 = vmul.f32 %v996_v22, %v967_v45  ;;  %776 = vrsqrt.f32 %v993_v15  ;;  %vm1030_vm3 = vmor %vm239_vm12, %vm240_vm14 }
 0x110   :  { %v235_v27 = vmul.f32 %v773_v10, %v234_v19  ;;  %v202_v31 = vsel %vm1007_vm13, %v965_v43, %v198_v14  ;;  %v212_v62 = vsel %vm1039_vm4, %v961_v37, %v208_v50  ;;  %vm249_vm5 = vweird.f32 %v993_v15 }
 0x111   :  { %v192_v25 = vsel %vm191_vm9, %v769_v47, %v188_v17  ;;  %v226_v26 = vmul.f32 0.5, %v225_v18  ;;  %v215_v23 = vmul.f32 %v996_v22, %v214_v20  ;;  %v255_v48 = vmul.f32 %v202_v31, %v886_v29  ;;  %v410_v24 = vld [vmem:[#allocation6] sm:$0xff] }
 0x112   :  { %v254_v32 = vmul.f32 %v192_v25, %v901_v41  ;;  %v236_v34 = vmul.f32 0.5, %v235_v27  ;;  %v256_v9 = vmul.f32 %v212_v62, %v898_v40  ;;  %vm220_vm8 = vweird.f32 %v996_v22 }
 0x113   :  { %v227_v33 = vsub.f32 1.5, %v226_v26  ;;  %v216_v53 = vmul.f32 0.5, %v215_v23  ;;  %v267_v59 = vmul.f32 %v976_v52, %v255_v48  ;;  %vm221_vm10 = vmor %vm219_vm7, %vm220_vm8  ;;  %vm602_vm11 = vcmask 523264  }
 0x114   :  { %v266_v36 = vmul.f32 %v976_v52, %v254_v32  ;;  %v237_v43 = vsub.f32 1.5, %v236_v34  ;;  %v268_v14 = vmul.f32 %v976_v52, %v256_v9 }
 0x115   :  { %v228_v41 = vmul.f32 %v771_v4, %v227_v33  ;;  %v777_v49 = vpop.eup %776  ;;  %v217_v63 = vsub.f32 1.5, %v216_v53  ;;  %v279_v28 = vadd.f32 %v986_v61, %v267_v59 }
 0x116   :  { %v278_v47 = vadd.f32 %v986_v61, %v266_v36  ;;  %v238_v51 = vmul.f32 %v773_v10, %v237_v43  ;;  %v244_v39 = vmul.f32 %v777_v49, %v993_v15  ;;  %vm250_vm6 = vweird.f32 %v777_v49 }
 0x117   :  { %v232_v21 = vsel %vm1019_vm15, %v771_v4, %v228_v41  ;;  %vm251_vm9 = vmor %vm249_vm5, %vm250_vm6  ;;  %v280_v45 = vadd.f32 %v986_v61, %v268_v14 }
 0x118   :  { %725 = vmatmul.msk.f32.gmra.mxu0 %vm66_vm0, %v278_v47  ;;  %v258_v56 = vmul.f32 %v232_v21, %v904_v42  ;;  %v242_v29 = vsel %vm1030_vm3, %v773_v10, %v238_v51  ;;  %v245_v57 = vmul.f32 %v777_v49, %v244_v39  ;;  %v218_v10 = vmul.f32 %v996_v22, %v217_v63 }
 0x119   :  { %v259_v42 = vmul.f32 %v242_v29, %v923_v55 }
 0x11a   :  { %v270_v60 = vmul.f32 %v976_v52, %v258_v56  ;;  %v246_v3 = vmul.f32 0.5, %v245_v57  ;;  %v222_v15 = vsel %vm221_vm10, %v996_v22, %v218_v10 }
 0x11b   :  { %v271_v11 = vmul.f32 %v976_v52, %v259_v42  ;;  %v257_v17 = vmul.f32 %v222_v15, %v912_v46  ;;  %v1086_v46 = vld [vmem:[%s1246_s4] ss:$0 sm:$0xff] }
 0x11c   :  { %v282_v4 = vadd.f32 %v986_v61, %v270_v60  ;;  %v247_v5 = vsub.f32 1.5, %v246_v3  ;;  %v418_v47 = vmul.f32 %v1086_v46, %v410_v24 }
 0x11d   :  { %v283_v40 = vadd.f32 %v986_v61, %v271_v11  ;;  %v269_v19 = vmul.f32 %v976_v52, %v257_v17 }
 0x11e   :  { %729 = vmatmul.msk.f32.vlgmr.msra.gmra.mxu3 %vm66_vm0, %v282_v4  ;;  %v248_v37 = vmul.f32 %v777_v49, %v247_v5 }
 0x11f   :  { %v281_v22 = vadd.f32 %v986_v61, %v269_v19 }
 0x120   :  { %726 = vmatmul.msk.f32.gmra.mxu0 %vm66_vm0, %v279_v28  ;;  %v252_v55 = vsel %vm251_vm9, %v777_v49, %v248_v37 }
 0x121   :  { %v260_v16 = vmul.f32 %v252_v55, %v929_v58  ;;  %v1081_v58 = vld [vmem:[%s1245_s3] ss:$0 sm:$0xff]  ;;  %s781_s3 = smov 32  }
 0x123   :  { %v272_v18 = vmul.f32 %v976_v52, %v260_v16  ;;  %v411_v52 = vld [vmem:[#allocation7] sm:$0xff] }
 0x124   :  { %v415_v26 = vmul.f32 %v1086_v46, %v411_v52  ;;  %v419_v48 = vmul.f32 %v1081_v58, %v411_v52 }
 0x125   :  { %v284_v20 = vadd.f32 %v986_v61, %v272_v18  ;;  %v414_v61 = vmul.f32 %v1081_v58, %v410_v24 }
 0x126   :  { %730 = vmatmul.msk.f32.gmra.mxu3 %vm66_vm0, %v283_v40  ;;  %v420_v49 = vadd.f32 %v419_v48, %v418_v47  ;;  %v599_v47 = vld [vmem:[%s1248_s6 + $0x28] sm:$0xff] }
 0x127   :  { %v416_v27 = vsub.f32 %v414_v61, %v415_v26 }
 0x128   :  { %727 = vmatmul.msk.f32.gmra.mxu0 %vm66_vm0, %v280_v45 }
 0x12e   :  { %731 = vmatmul.msk.f32.gmra.mxu3 %vm66_vm0, %v284_v20 }
 0x130   :  { %728 = vmatmul.msk.f32.gmra.mxu0 %vm66_vm0, %v281_v22 }
 0x18b   :  { %v330_v25 = vpop.f32.mrf.mxu0 }
 0x18c   :  { %354 = vst.msk [vmem:[#allocation2] sm:$0xff] %vm66_vm0, %v330_v25  ;;  %370 = vrot.lane.b32.xlu1 %v330_v25, %s780_s29 }
 0x193   :  { %v412_v30 = vld [vmem:[#allocation2] sm:$0xff] }
 0x194   :  { %v417_v32 = vadd.f32 %v416_v27, %v412_v30 }
 0x195   :  { %v333_v31 = vpop.f32.mrf.mxu0 }
 0x196   :  { %355 = vst.msk [vmem:[#allocation2 + $0x8] sm:$0xff] %vm66_vm0, %v333_v31  ;;  %372 = vrot.lane.b32.xlu2 %v333_v31, %s780_s29  ;;  %v428_v53 = vmul.f32 %v1081_v58, %v417_v32  ;;  %v432_v54 = vmul.f32 %v1086_v46, %v417_v32 }
 0x197   :  { %422 = vst.msk [vmem:[#allocation4] sm:$0xff] %vm66_vm0, %v417_v32 }
 0x19d   :  { %v336_v33 = vpop.f32.mrf.mxu0  ;;  %v425_v59 = vld [vmem:[#allocation2 + $0x8] sm:$0xff] }
 0x19e   :  { %356 = vst.msk [vmem:[#allocation2 + $0x10] sm:$0xff] %vm66_vm0, %v336_v33  ;;  %374 = vrot.lane.b32.xlu0 %v336_v33, %s780_s29 }
 0x1a1   :  { %v345_v34 = vpop.f32.mrf.mxu3 }
 0x1a2   :  { %359 = vst.msk [vmem:[#allocation2 + $0x28] sm:$0xff] %vm66_vm0, %v345_v34 }
 0x1a5   :  { %v339_v23 = vpop.f32.mrf.mxu0  ;;  %v441_v37 = vld [vmem:[#allocation2 + $0x10] sm:$0xff] }
 0x1a6   :  { %357 = vst.msk [vmem:[#allocation2 + $0x18] sm:$0xff] %vm66_vm0, %v339_v23  ;;  %380 = vrot.lane.b32.xlu0 %v345_v34, %s780_s29  ;;  %376 = vrot.lane.b32.xlu2 %v339_v23, %s780_s29 }
 0x1a9   :  { %v348_v35 = vpop.f32.mrf.mxu3 }
 0x1aa   :  { %360 = vst.msk [vmem:[#allocation2 + $0x30] sm:$0xff] %vm66_vm0, %v348_v35 }
 0x1ad   :  { %v342_v36 = vpop.f32.mrf.mxu0  ;;  %v457_v22 = vld [vmem:[#allocation2 + $0x18] sm:$0xff] }
 0x1ae   :  { %358 = vst.msk [vmem:[#allocation2 + $0x20] sm:$0xff] %vm66_vm0, %v342_v36  ;;  %382 = vrot.lane.b32.xlu2 %v348_v35, %s780_s29  ;;  %378 = vrot.lane.b32.xlu1 %v342_v36, %s780_s29 }
 0x1b1   :  { %v351_v44 = vpop.f32.mrf.mxu3 }
 0x1b2   :  { %361 = vst.msk [vmem:[#allocation2 + $0x38] sm:$0xff] %vm66_vm0, %v351_v44 }
 0x1b5   :  { %v473_v33 = vld [vmem:[#allocation2 + $0x20] sm:$0xff] }
 0x1b6   :  { %384 = vrot.lane.b32.xlu1 %v351_v44, %s780_s29  ;;  %v601_v44 = vld [vmem:[%s1248_s6 + $0x38] sm:$0xff] }
 0x1b7   :  { %635 = vmatpush.msra.mxu1 %v601_v44  ;;  %744 = vmatpush.msra.mxu2 %v601_v44 }
 0x1f0   :  { %v373_v41 = vpop.permute.xlu2 %372 }
 0x1f1   :  { %395 = vst.msk [vmem:[#allocation3 + $0x8] sm:$0xff] %vm66_vm0, %v373_v41  ;;  %v600_v41 = vld [vmem:[%s1248_s6 + $0x30] sm:$0xff] }
 0x1f2   :  { %636 = vmatpush.msra.mxu1 %v600_v41  ;;  %745 = vmatpush.msra.mxu2 %v600_v41 }
 0x1f4   :  { %637 = vmatpush.msra.mxu1 %v599_v47  ;;  %746 = vmatpush.msra.mxu2 %v599_v47 }
 0x1f8   :  { %v427_v60 = vld [vmem:[#allocation3 + $0x8] sm:$0xff] }
 0x1fe   :  { %v371_v43 = vpop.permute.xlu1 %370 }
 0x1ff   :  { %394 = vst.msk [vmem:[#allocation3] sm:$0xff] %vm66_vm0, %v371_v43 }
 0x200   :  { %v377_v38 = vpop.permute.xlu2 %376 }
 0x201   :  { %397 = vst.msk [vmem:[#allocation3 + $0x18] sm:$0xff] %vm66_vm0, %v377_v38 }
 0x206   :  { %v413_v50 = vld [vmem:[#allocation3] sm:$0xff] }
 0x207   :  { %v421_v51 = vadd.f32 %v420_v49, %v413_v50 }
 0x208   :  { %v383_v21 = vpop.permute.xlu2 %382  ;;  %v459_v24 = vld [vmem:[#allocation3 + $0x18] sm:$0xff] }
 0x209   :  { %400 = vst.msk [vmem:[#allocation3 + $0x30] sm:$0xff] %vm66_vm0, %v383_v21  ;;  %v429_v39 = vmul.f32 %v1086_v46, %v421_v51  ;;  %v433_v56 = vmul.f32 %v1081_v58, %v421_v51  ;;  %v598_v21 = vld [vmem:[%s1248_s6 + $0x20] sm:$0xff] }
 0x20a   :  { %423 = vst.msk [vmem:[#allocation5] sm:$0xff] %vm66_vm0, %v421_v51  ;;  %638 = vmatpush.msra.mxu1 %v598_v21  ;;  %747 = vmatpush.msra.mxu2 %v598_v21 }
 0x20b   :  { %v430_v29 = vsub.f32 %v428_v53, %v429_v39  ;;  %v434_v57 = vadd.f32 %v433_v56, %v432_v54  ;;  %v489_v54 = vld [vmem:[#allocation2 + $0x28] sm:$0xff] }
 0x20d   :  { %v431_v62 = vadd.f32 %v430_v29, %v425_v59  ;;  %v435_v63 = vadd.f32 %v434_v57, %v427_v60  ;;  %v597_v57 = vld [vmem:[%s1248_s6 + $0x18] sm:$0xff] }
 0x20e   :  { %639 = vmatpush.msra.mxu1 %v597_v57  ;;  %748 = vmatpush.msra.mxu2 %v597_v57 }
 0x20f   :  { %v444_v4 = vmul.f32 %v1081_v58, %v431_v62  ;;  %v445_v42 = vmul.f32 %v1086_v46, %v435_v63  ;;  %437 = vst.msk [vmem:[#allocation4 + $0x8] sm:$0xff] %vm66_vm0, %v431_v62  ;;  %v448_v9 = vmul.f32 %v1086_v46, %v431_v62  ;;  %v449_v10 = vmul.f32 %v1081_v58, %v435_v63 }
 0x210   :  { %v375_v3 = vpop.permute.xlu0 %374  ;;  %439 = vst.msk [vmem:[#allocation5 + $0x8] sm:$0xff] %vm66_vm0, %v435_v63 }
 0x211   :  { %396 = vst.msk [vmem:[#allocation3 + $0x10] sm:$0xff] %vm66_vm0, %v375_v3  ;;  %v546_v5 = vld [vmem:[#allocation5] sm:$0xff]  ;;  %v446_v28 = vsub.f32 %v444_v4, %v445_v42  ;;  %v450_v55 = vadd.f32 %v449_v10, %v448_v9  ;;  %v596_v3 = vld [vmem:[%s1248_s6 + $0x10] sm:$0xff] }
 0x212   :  { %562 = vrot.lane.b32.xlu2 %v546_v5, %s781_s3  ;;  %v505_v9 = vld [vmem:[#allocation2 + $0x30] sm:$0xff]  ;;  %640 = vmatpush.msra.mxu1 %v596_v3 }
 0x213   :  { %v447_v11 = vadd.f32 %v446_v28, %v441_v37  ;;  %v595_v28 = vld [vmem:[%s1248_s6 + $0x8] sm:$0xff]  ;;  %v507_v10 = vld [vmem:[#allocation3 + $0x30] sm:$0xff]  ;;  %749 = vmatpush.msra.mxu2 %v596_v3 }
 0x214   :  { %641 = vmatpush.msra.mxu1 %v595_v28 }
 0x215   :  { %453 = vst.msk [vmem:[#allocation4 + $0x10] sm:$0xff] %vm66_vm0, %v447_v11  ;;  %v460_v16 = vmul.f32 %v1081_v58, %v447_v11  ;;  %v464_v45 = vmul.f32 %v1086_v46, %v447_v11  ;;  %750 = vmatpush.msra.mxu2 %v595_v28 }
 0x218   :  { %v443_v14 = vld [vmem:[#allocation3 + $0x10] sm:$0xff]  ;;  %v381_v15 = vpop.permute.xlu0 %380 }
 0x219   :  { %v451_v40 = vadd.f32 %v450_v55, %v443_v14  ;;  %399 = vst.msk [vmem:[#allocation3 + $0x28] sm:$0xff] %vm66_vm0, %v381_v15 }
 0x21b   :  { %v461_v17 = vmul.f32 %v1086_v46, %v451_v40  ;;  %v465_v18 = vmul.f32 %v1081_v58, %v451_v40  ;;  %455 = vst.msk [vmem:[#allocation5 + $0x10] sm:$0xff] %vm66_vm0, %v451_v40 }
 0x21c   :  { %v540_v47 = vld [vmem:[#allocation4 + $0x10] sm:$0xff] }
 0x21d   :  { %v462_v19 = vsub.f32 %v460_v16, %v461_v17  ;;  %v466_v20 = vadd.f32 %v465_v18, %v464_v45  ;;  %v521_v18 = vld [vmem:[#allocation2 + $0x38] sm:$0xff] }
 0x21f   :  { %v463_v52 = vadd.f32 %v462_v19, %v457_v22  ;;  %v467_v25 = vadd.f32 %v466_v20, %v459_v24  ;;  %v547_v20 = vld [vmem:[#allocation5 + $0x8] sm:$0xff] }
 0x220   :  { %v379_v61 = vpop.permute.xlu1 %378  ;;  %v491_v39 = vld [vmem:[#allocation3 + $0x28] sm:$0xff] }
 0x221   :  { %398 = vst.msk [vmem:[#allocation3 + $0x20] sm:$0xff] %vm66_vm0, %v379_v61  ;;  %v476_v26 = vmul.f32 %v1081_v58, %v463_v52  ;;  %v477_v27 = vmul.f32 %v1086_v46, %v467_v25  ;;  %v480_v31 = vmul.f32 %v1086_v46, %v463_v52  ;;  %v481_v32 = vmul.f32 %v1081_v58, %v467_v25  ;;  %v594_v61 = vld [vmem:[%s1248_s6] sm:$0xff] }
 0x222   :  { %469 = vst.msk [vmem:[#allocation4 + $0x18] sm:$0xff] %vm66_vm0, %v463_v52  ;;  %642 = vmatpush.msra.mxu1 %v594_v61  ;;  %751 = vmatpush.msra.mxu2 %v594_v61 }
 0x223   :  { %v478_v30 = vsub.f32 %v476_v26, %v477_v27  ;;  %471 = vst.msk [vmem:[#allocation5 + $0x18] sm:$0xff] %vm66_vm0, %v467_v25  ;;  %v482_v23 = vadd.f32 %v481_v32, %v480_v31  ;;  %v538_v27 = vld [vmem:[#allocation4] sm:$0xff] }
 0x225   :  { %v479_v34 = vadd.f32 %v478_v30, %v473_v33 }
 0x227   :  { %485 = vst.msk [vmem:[#allocation4 + $0x20] sm:$0xff] %vm66_vm0, %v479_v34  ;;  %v492_v38 = vmul.f32 %v1081_v58, %v479_v34  ;;  %v496_v49 = vmul.f32 %v1086_v46, %v479_v34 }
 0x228   :  { %v475_v35 = vld [vmem:[#allocation3 + $0x20] sm:$0xff]  ;;  %v385_v36 = vpop.permute.xlu1 %384 }
 0x229   :  { %v483_v43 = vadd.f32 %v482_v23, %v475_v35  ;;  %401 = vst.msk [vmem:[#allocation3 + $0x38] sm:$0xff] %vm66_vm0, %v385_v36  ;;  %v539_v35 = vld [vmem:[#allocation4 + $0x8] sm:$0xff] }
 0x22a   :  { %v549_v25 = vld [vmem:[#allocation5 + $0x18] sm:$0xff] }
 0x22b   :  { %v493_v48 = vmul.f32 %v1086_v46, %v483_v43  ;;  %v497_v50 = vmul.f32 %v1081_v58, %v483_v43  ;;  %487 = vst.msk [vmem:[#allocation5 + $0x20] sm:$0xff] %vm66_vm0, %v483_v43 }
 0x22d   :  { %v494_v51 = vsub.f32 %v492_v38, %v493_v48  ;;  %v498_v53 = vadd.f32 %v497_v50, %v496_v49 }
 0x22e   :  { %v542_v32 = vld [vmem:[#allocation4 + $0x20] sm:$0xff] }
 0x22f   :  { %v495_v56 = vadd.f32 %v494_v51, %v489_v54  ;;  %v499_v29 = vadd.f32 %v498_v53, %v491_v39  ;;  %v541_v53 = vld [vmem:[#allocation4 + $0x18] sm:$0xff] }
 0x230   :  { %v523_v19 = vld [vmem:[#allocation3 + $0x38] sm:$0xff] }
 0x231   :  { %501 = vst.msk [vmem:[#allocation4 + $0x28] sm:$0xff] %vm66_vm0, %v495_v56  ;;  %v508_v59 = vmul.f32 %v1081_v58, %v495_v56  ;;  %v509_v60 = vmul.f32 %v1086_v46, %v499_v29  ;;  %v512_v62 = vmul.f32 %v1086_v46, %v495_v56  ;;  %v513_v63 = vmul.f32 %v1081_v58, %v499_v29 }
 0x232   :  { %503 = vst.msk [vmem:[#allocation5 + $0x28] sm:$0xff] %vm66_vm0, %v499_v29  ;;  %v550_v4 = vld [vmem:[#allocation5 + $0x20] sm:$0xff] }
 0x233   :  { %v510_v42 = vsub.f32 %v508_v59, %v509_v60  ;;  %v514_v5 = vadd.f32 %v513_v63, %v512_v62  ;;  %570 = vrot.lane.b32.xlu0 %v550_v4, %s781_s3 }
 0x235   :  { %v511_v37 = vadd.f32 %v510_v42, %v505_v9  ;;  %v515_v11 = vadd.f32 %v514_v5, %v507_v10 }
 0x237   :  { %v528_v55 = vmul.f32 %v1086_v46, %v511_v37  ;;  %v529_v14 = vmul.f32 %v1081_v58, %v515_v11  ;;  %517 = vst.msk [vmem:[#allocation4 + $0x30] sm:$0xff] %vm66_vm0, %v511_v37  ;;  %v524_v15 = vmul.f32 %v1081_v58, %v511_v37  ;;  %v525_v40 = vmul.f32 %v1086_v46, %v515_v11  ;;  %v548_v46 = vld [vmem:[#allocation5 + $0x10] sm:$0xff] }
 0x238   :  { %519 = vst.msk [vmem:[#allocation5 + $0x30] sm:$0xff] %vm66_vm0, %v515_v11  ;;  %v543_v36 = vld [vmem:[#allocation4 + $0x28] sm:$0xff] }
 0x239   :  { %v530_v16 = vadd.f32 %v529_v14, %v528_v55  ;;  %v551_v45 = vld [vmem:[#allocation5 + $0x28] sm:$0xff]  ;;  %v526_v17 = vsub.f32 %v524_v15, %v525_v40 }
 0x23a   :  { %572 = vrot.lane.b32.xlu1 %v551_v45, %s781_s3 }
 0x23b   :  { %v531_v22 = vadd.f32 %v530_v16, %v523_v19  ;;  %564 = vrot.lane.b32.xlu0 %v547_v20, %s781_s3  ;;  %v527_v24 = vadd.f32 %v526_v17, %v521_v18 }
 0x23d   :  { %537 = vst.msk [vmem:[#allocation7] sm:$0xff] %vm66_vm0, %v531_v22 }
 0x23e   :  { %535 = vst.msk [vmem:[#allocation5 + $0x38] sm:$0xff] %vm66_vm0, %v531_v22  ;;  %v544_v48 = vld [vmem:[#allocation4 + $0x30] sm:$0xff] }
 0x23f   :  { %v552_v58 = vld [vmem:[#allocation5 + $0x30] sm:$0xff]  ;;  %533 = vst.msk [vmem:[#allocation4 + $0x38] sm:$0xff] %vm66_vm0, %v527_v24 }
 0x240   :  { %574 = vrot.lane.b32.xlu2 %v552_v58, %s781_s3  ;;  %536 = vst.msk [vmem:[#allocation6] sm:$0xff] %vm66_vm0, %v527_v24 }
 0x242   :  { %566 = vrot.lane.b32.xlu1 %v548_v46, %s781_s3 }
 0x245   :  { %v553_v52 = vld [vmem:[#allocation5 + $0x38] sm:$0xff] }
 0x246   :  { %576 = vrot.lane.b32.xlu0 %v553_v52, %s781_s3  ;;  %v545_v54 = vld [vmem:[#allocation4 + $0x38] sm:$0xff] }
 0x248   :  { %568 = vrot.lane.b32.xlu2 %v549_v25, %s781_s3 }
 0x26c   :  { %v563_v26 = vpop.permute.xlu2 %562 }
 0x26d   :  { %v586_v30 = vsel %vm66_vm0, %v538_v27, %v563_v26 }
 0x26e   :  { %732 = vmatmul.msk.f32.vlgmr.msra.gmra.mxu1 %vm602_vm11, %v586_v30 }
 0x29a   :  { %v575_v43 = vpop.permute.xlu2 %574 }
 0x29b   :  { %v592_v50 = vsel %vm66_vm0, %v544_v48, %v575_v43 }
 0x2a2   :  { %v569_v21 = vpop.permute.xlu2 %568 }
 0x2a3   :  { %v589_v39 = vsel %vm66_vm0, %v541_v53, %v569_v21 }
 0x2a5   :  { %v571_v31 = vpop.permute.xlu0 %570 }
 0x2a6   :  { %v590_v33 = vsel %vm66_vm0, %v542_v32, %v571_v31 }
 0x2a7   :  { %736 = vmatmul.msk.f32.vlgmr.msra.gmra.mxu2 %vm602_vm11, %v590_v33 }
 0x2ac   :  { %v573_v34 = vpop.permute.xlu1 %572 }
 0x2ad   :  { %v565_v23 = vpop.permute.xlu0 %564  ;;  %v591_v41 = vsel %vm66_vm0, %v543_v36, %v573_v34 }
 0x2ae   :  { %v587_v44 = vsel %vm66_vm0, %v539_v35, %v565_v23 }
 0x2af   :  { %733 = vmatmul.msk.f32.gmra.mxu1 %vm602_vm11, %v587_v44  ;;  %737 = vmatmul.msk.f32.gmra.mxu2 %vm602_vm11, %v591_v41 }
 0x2b4   :  { %v567_v38 = vpop.permute.xlu1 %566 }
 0x2b5   :  { %v588_v49 = vsel %vm66_vm0, %v540_v47, %v567_v38 }
 0x2b7   :  { %734 = vmatmul.msk.f32.gmra.mxu1 %vm602_vm11, %v588_v49  ;;  %738 = vmatmul.msk.f32.gmra.mxu2 %vm602_vm11, %v592_v50 }
 0x2b8   :  { %v577_v51 = vpop.permute.xlu0 %576 }
 0x2b9   :  { %v593_v56 = vsel %vm66_vm0, %v545_v54, %v577_v51 }
 0x2bf   :  { %735 = vmatmul.msk.f32.gmra.mxu1 %vm602_vm11, %v589_v39  ;;  %739 = vmatmul.msk.f32.gmra.mxu2 %vm602_vm11, %v593_v56 }
 0x2eb   :  { %v644_v29 = vpop.f32.mrf.mxu1 }
 0x2ec   :  { %v668_v57 = vmax.f32 %v644_v29, 0.0 }
 0x2ee   :  { %v676_v59 = vadd.f32 %v668_v57, %v830_v1 }
 0x2f0   :  { %684 = vst.msk [vmem:[%s1249_s7] sm:$0xff] %vm66_vm0, %v676_v59 }
 0x32a   :  { %v656_v60 = vpop.f32.mrf.mxu2 }
 0x32b   :  { %v672_v62 = vmax.f32 %v656_v60, 0.0 }
 0x32c   :  { %v647_v63 = vpop.f32.mrf.mxu1 }
 0x32d   :  { %v680_v3 = vadd.f32 %v672_v62, %v835_v2  ;;  %v669_v4 = vmax.f32 %v647_v63, 0.0 }
 0x32f   :  { %688 = vst.msk [vmem:[%s1249_s7 + $0x20] sm:$0xff] %vm66_vm0, %v680_v3  ;;  %v677_v42 = vadd.f32 %v669_v4, %v851_v7 }
 0x331   :  { %685 = vst.msk [vmem:[%s1249_s7 + $0x8] sm:$0xff] %vm66_vm0, %v677_v42 }
 0x332   :  { %v659_v1 = vpop.f32.mrf.mxu2 }
 0x333   :  { %v673_v5 = vmax.f32 %v659_v1, 0.0 }
 0x334   :  { %v650_v28 = vpop.f32.mrf.mxu1 }
 0x335   :  { %v681_v9 = vadd.f32 %v673_v5, %v856_v8  ;;  %v670_v10 = vmax.f32 %v650_v28, 0.0 }
 0x337   :  { %689 = vst.msk [vmem:[%s1249_s7 + $0x28] sm:$0xff] %vm66_vm0, %v681_v9  ;;  %v678_v2 = vadd.f32 %v670_v10, %v825_v0 }
 0x339   :  { %686 = vst.msk [vmem:[%s1249_s7 + $0x10] sm:$0xff] %vm66_vm0, %v678_v2 }
 0x33a   :  { %v662_v7 = vpop.f32.mrf.mxu2 }
 0x33b   :  { %v674_v37 = vmax.f32 %v662_v7, 0.0 }
 0x33c   :  { %v653_v11 = vpop.f32.mrf.mxu1 }
 0x33d   :  { %v682_v55 = vadd.f32 %v674_v37, %v867_v12  ;;  %v671_v14 = vmax.f32 %v653_v11, 0.0 }
 0x33f   :  { %690 = vst.msk [vmem:[%s1249_s7 + $0x30] sm:$0xff] %vm66_vm0, %v682_v55  ;;  %v679_v8 = vadd.f32 %v671_v14, %v846_v6 }
 0x341   :  { %687 = vst.msk [vmem:[%s1249_s7 + $0x18] sm:$0xff] %vm66_vm0, %v679_v8 }
 0x342   :  { %v665_v0 = vpop.f32.mrf.mxu2 }
 0x343   :  { %v675_v15 = vmax.f32 %v665_v0, 0.0 }
 0x345   :  { %v683_v40 = vadd.f32 %v675_v15, %v872_v13 }
 0x347   :  { %691 = vst.msk [vmem:[%s1249_s7 + $0x38] sm:$0xff] %vm66_vm0, %v683_v40 }

</bundles_post_ra>
